<compile_context>
chip_gen: v7x
topology: tpu7x:2x2x1
jax: 0.10.0
libtpu: 0.0.40
codegen_flags: <defaults>
</compile_context>

<pallas_src>
import functools
import math

import jax
import jax.numpy as jnp
from jax import lax
from jax.experimental import pallas as pl
from jax.experimental.pallas import tpu as pltpu

# ------------------------- small synthetic config --------------------------
BATCH = 2
CHANNELS = 3
IMAGE_SIZE = 16
PATCH = 8
GRID_SIDE = IMAGE_SIZE // PATCH          # num_patches_per_side = 2
NUM_PATCHES = GRID_SIDE * GRID_SIDE      # 4 tokens per image (no CLS token)
HIDDEN = 32
NUM_HEADS = 4
HEAD_DIM = HIDDEN // NUM_HEADS           # 8
INTERMEDIATE = 64
NUM_LAYERS = 2
SELECT_LAYER = -2                        # args.mm_vision_select_layer
SELECT_FEATURE = "patch"                 # args.mm_vision_select_feature
LN_EPS = 1e-6

_GELU_C = math.sqrt(2.0 / math.pi)       # "gelu_pytorch_tanh"

# hidden_states[SELECT_LAYER] is produced after this many encoder layers;
# later layers are dead work and are never packed nor computed.
NUM_COMPUTED = SELECT_LAYER if SELECT_LAYER >= 0 else NUM_LAYERS + 1 + SELECT_LAYER

# Rows of the packed per-layer "small vectors" slab (zero-padded to VEC_WIDTH).
_ROW_LN1_G, _ROW_LN1_B, _ROW_QKV_B, _ROW_O_B = 0, 1, 2, 3
_ROW_LN2_G, _ROW_LN2_B, _ROW_FC1_B, _ROW_FC2_B = 4, 5, 6, 7
_NUM_VEC_ROWS = 8
VEC_WIDTH = max(3 * HIDDEN, INTERMEDIATE)


# ------------------------------ fused kernel --------------------------------
def _siglip_tower_kernel(patches_ref, pw_ref, pos_ref, vec_ref,
                         qkvw_ref, ow_ref, fc1w_ref, fc2w_ref,
                         out_ref, ctx_scr, *, num_layers, num_heads, head_dim):
    """One grid step == one image: patch-embed + pos-embed + encoder layers.

    Matmul operands are bf16 (f32 accumulation); layernorm / softmax / gelu /
    reciprocal stay in f32. Attention is per-image (no batch mask needed).
    """
    hidden = ow_ref.shape[-1]
    inter = fc1w_ref.shape[-1]

    # ---- patch embedding (Conv2d-as-matmul) + (pos + conv bias) ------------
    h = (jnp.dot(patches_ref[...], pw_ref[...],
                 preferred_element_type=jnp.float32)
         + pos_ref[...])                                          # (S, D) f32

    def layer_norm(x, g, b):
        mu = jnp.mean(x, axis=-1, keepdims=True)
        xc = x - mu
        var = jnp.mean(xc * xc, axis=-1, keepdims=True)
        return xc * lax.rsqrt(var + LN_EPS) * g + b

    for li in range(num_layers):            # tiny static layer count
        vec = vec_ref[li]                                         # (8, W) f32
        ln1_g = vec[_ROW_LN1_G:_ROW_LN1_G + 1, :hidden]
        ln1_b = vec[_ROW_LN1_B:_ROW_LN1_B + 1, :hidden]
        qkv_b = vec[_ROW_QKV_B:_ROW_QKV_B + 1, :3 * hidden]
        o_b = vec[_ROW_O_B:_ROW_O_B + 1, :hidden]
        ln2_g = vec[_ROW_LN2_G:_ROW_LN2_G + 1, :hidden]
        ln2_b = vec[_ROW_LN2_B:_ROW_LN2_B + 1, :hidden]
        fc1_b = vec[_ROW_FC1_B:_ROW_FC1_B + 1, :inter]
        fc2_b = vec[_ROW_FC2_B:_ROW_FC2_B + 1, :hidden]

        # -------------------- self-attention block -------------------------
        residual = h
        x = layer_norm(h, ln1_g, ln1_b)
        # fused QKV projection; 1/sqrt(head_dim) pre-folded into q weights/bias
        qkv = (jnp.dot(x.astype(jnp.bfloat16), qkvw_ref[li],
                       preferred_element_type=jnp.float32) + qkv_b)  # (S, 3D)

        # Per-head scores/softmax/PV; contexts assembled into one (S, D) slab
        # so the out-projection is a single full-contraction-depth matmul.
        # TODO(synk): at real SigLIP sizes (H=16, Dh=72) replace the static
        # head loop + lane slices with a head-batched dot_general on a padded
        # (non-lane) head layout.
        for hd in range(num_heads):
            q = qkv[:, hd * head_dim:(hd + 1) * head_dim]
            k = qkv[:, hidden + hd * head_dim:hidden + (hd + 1) * head_dim]
            v = qkv[:, 2 * hidden + hd * head_dim:2 * hidden + (hd + 1) * head_dim]
            s = lax.dot_general(q.astype(jnp.bfloat16), k.astype(jnp.bfloat16),
                                (((1,), (1,)), ((), ())),
                                preferred_element_type=jnp.float32)   # (S, S)
            m = jnp.max(s, axis=-1, keepdims=True)
            p = jnp.exp(s - m)
            p = p * pl.reciprocal(jnp.sum(p, axis=-1, keepdims=True),
                                  approx=True)
            ctx_scr[:, hd * head_dim:(hd + 1) * head_dim] = jnp.dot(
                p.astype(jnp.bfloat16), v.astype(jnp.bfloat16),
                preferred_element_type=jnp.float32)                   # (S, Dh)

        h = residual + o_b + jnp.dot(ctx_scr[...].astype(jnp.bfloat16),
                                     ow_ref[li],
                                     preferred_element_type=jnp.float32)

        # --------------------------- MLP block ------------------------------
        residual = h
        x = layer_norm(h, ln2_g, ln2_b)
        x = (jnp.dot(x.astype(jnp.bfloat16), fc1w_ref[li],
                     preferred_element_type=jnp.float32) + fc1_b)
        x = 0.5 * x * (1.0 + jnp.tanh(_GELU_C * (x + 0.044715 * x * x * x)))
        h = (residual + fc2_b + jnp.dot(x.astype(jnp.bfloat16), fc2w_ref[li],
                                        preferred_element_type=jnp.float32))

    out_ref[...] = h.astype(out_ref.dtype)


# ------------------------------ parameter init ------------------------------
def init_params(key):
    def nrm(k, shape):
        return jax.random.normal(k, shape, dtype=jnp.float32) * 0.02

    keys = jax.random.split(key, 3 + NUM_LAYERS)
    params = {
        # Conv2d(C, D, kernel=P, stride=P); weight flattened (C, P, P) row-major.
        # NOTE: a real HF checkpoint stores (D, C, P, P) -> transpose when loading.
        "patch_w": nrm(keys[0], (CHANNELS * PATCH * PATCH, HIDDEN)),
        "patch_b": jnp.zeros((1, HIDDEN), jnp.float32),
        "pos": nrm(keys[1], (NUM_PATCHES, HIDDEN)),
        # post-layernorm exists in the checkpoint but is never applied when
        # features come from hidden_states[select_layer] (HF behavior).
        "post_ln_g": jnp.ones((1, HIDDEN), jnp.float32),
        "post_ln_b": jnp.zeros((1, HIDDEN), jnp.float32),
        "layers": [],
    }
    for li in range(NUM_LAYERS):
        lk = jax.random.split(keys[3 + li], 6)
        params["layers"].append({
            "ln1_g": jnp.ones((1, HIDDEN), jnp.float32),
            "ln1_b": jnp.zeros((1, HIDDEN), jnp.float32),
            "q_w": nrm(lk[0], (HIDDEN, HIDDEN)),
            "q_b": jnp.zeros((1, HIDDEN), jnp.float32),
            "k_w": nrm(lk[1], (HIDDEN, HIDDEN)),
            "k_b": jnp.zeros((1, HIDDEN), jnp.float32),
            "v_w": nrm(lk[2], (HIDDEN, HIDDEN)),
            "v_b": jnp.zeros((1, HIDDEN), jnp.float32),
            "o_w": nrm(lk[3], (HIDDEN, HIDDEN)),
            "o_b": jnp.zeros((1, HIDDEN), jnp.float32),
            "ln2_g": jnp.ones((1, HIDDEN), jnp.float32),
            "ln2_b": jnp.zeros((1, HIDDEN), jnp.float32),
            "fc1_w": nrm(lk[4], (HIDDEN, INTERMEDIATE)),
            "fc1_b": jnp.zeros((1, INTERMEDIATE), jnp.float32),
            "fc2_w": nrm(lk[5], (INTERMEDIATE, HIDDEN)),
            "fc2_b": jnp.zeros((1, HIDDEN), jnp.float32),
        })
    return params


# --------------------- one-time weight packing (off the hot path) ------------
def pack_params(params):
    """Pre-pack weights into the kernel-facing layout/dtype. Called ONCE."""
    scale = HEAD_DIM ** -0.5
    layers = params["layers"][:max(NUM_COMPUTED, 1)]

    def padw(v):  # (1, w) -> (1, VEC_WIDTH)
        return jnp.pad(v, ((0, 0), (0, VEC_WIDTH - v.shape[1])))

    vecs, qkv_w, o_w, fc1_w, fc2_w = [], [], [], [], []
    for l in layers:
        # 1/sqrt(head_dim) folded into q weights and bias (static transform).
        qkv_w.append(jnp.concatenate([l["q_w"] * scale, l["k_w"], l["v_w"]],
                                     axis=1))                       # (D, 3D)
        qkv_b = jnp.concatenate([l["q_b"] * scale, l["k_b"], l["v_b"]], axis=1)
        vecs.append(jnp.concatenate(
            [padw(l["ln1_g"]), padw(l["ln1_b"]), padw(qkv_b), padw(l["o_b"]),
             padw(l["ln2_g"]), padw(l["ln2_b"]), padw(l["fc1_b"]),
             padw(l["fc2_b"])], axis=0))                            # (8, W)
        o_w.append(l["o_w"])
        fc1_w.append(l["fc1_w"])
        fc2_w.append(l["fc2_w"])

    return {
        "patch_w": params["patch_w"].astype(jnp.bfloat16),          # (CPP, D)
        "pos_pb": params["pos"] + params["patch_b"],                 # (S, D) f32
        "vecs": jnp.stack(vecs, 0),                                  # (L, 8, W) f32
        "qkv_w": jnp.stack(qkv_w, 0).astype(jnp.bfloat16),           # (L, D, 3D)
        "o_w": jnp.stack(o_w, 0).astype(jnp.bfloat16),               # (L, D, D)
        "fc1_w": jnp.stack(fc1_w, 0).astype(jnp.bfloat16),           # (L, D, I)
        "fc2_w": jnp.stack(fc2_w, 0).astype(jnp.bfloat16),           # (L, I, D)
    }


# ------------------------------- forward pass -------------------------------
def siglip_vision_tower_forward(images, packed):
    """Equivalent of SigLIPVisionTower.forward for a batched image tensor."""
    B, C, H, W = images.shape
    gh, gw = H // PATCH, W // PATCH
    S = gh * gw
    cpp = C * PATCH * PATCH

    # --- patch extraction (layout glue): NCHW -> (B, S, C*P*P), bf16 --------
    patches = (images.astype(jnp.float32)
               .reshape(B, C, gh, PATCH, gw, PATCH)
               .transpose(0, 2, 4, 1, 3, 5)
               .reshape(B, S, cpp)
               .astype(jnp.bfloat16))

    L = packed["qkv_w"].shape[0]
    kern = functools.partial(_siglip_tower_kernel, num_layers=NUM_COMPUTED,
                             num_heads=NUM_HEADS, head_dim=HEAD_DIM)

    feats = pl.pallas_call(
        kern,
        out_shape=jax.ShapeDtypeStruct((B, S, HIDDEN), jnp.float32),
        grid=(B,),
        in_specs=[
            pl.BlockSpec((None, S, cpp), lambda b: (b, 0, 0)),       # patches
            pl.BlockSpec((cpp, HIDDEN), lambda b: (0, 0)),            # patch_w
            pl.BlockSpec((S, HIDDEN), lambda b: (0, 0)),              # pos + bias
            pl.BlockSpec((L, _NUM_VEC_ROWS, VEC_WIDTH),
                         lambda b: (0, 0, 0)),                        # vec slab
            pl.BlockSpec((L, HIDDEN, 3 * HIDDEN), lambda b: (0, 0, 0)),
            pl.BlockSpec((L, HIDDEN, HIDDEN), lambda b: (0, 0, 0)),
            pl.BlockSpec((L, HIDDEN, INTERMEDIATE), lambda b: (0, 0, 0)),
            pl.BlockSpec((L, INTERMEDIATE, HIDDEN), lambda b: (0, 0, 0)),
        ],
        out_specs=pl.BlockSpec((None, S, HIDDEN), lambda b: (b, 0, 0)),
        scratch_shapes=[pltpu.VMEM((S, HIDDEN), jnp.float32)],        # ctx slab
        compiler_params=pltpu.CompilerParams(
            dimension_semantics=("parallel",)),
    )(patches, packed["patch_w"], packed["pos_pb"], packed["vecs"],
      packed["qkv_w"], packed["o_w"], packed["fc1_w"], packed["fc2_w"])

    # --- feature_select ------------------------------------------------------
    if SELECT_FEATURE == "patch":
        feats = feats[:, :]        # identity: SigLIP has no CLS token
    elif SELECT_FEATURE == "cls_patch":
        pass
    else:
        raise ValueError(f"Unexpected select feature: {SELECT_FEATURE}")

    return feats.astype(images.dtype)  # `.to(images.dtype)`


# ----------------------------------- main ------------------------------------
if __name__ == "__main__":
    key = jax.random.PRNGKey(0)
    pkey, ikey = jax.random.split(key)
    params = init_params(pkey)
    packed = pack_params(params)       # one-time packing, off the forward path

    images = jax.random.normal(ikey, (BATCH, CHANNELS, IMAGE_SIZE, IMAGE_SIZE),
                               dtype=jnp.float32)

    forward = jax.jit(siglip_vision_tower_forward)
    out = jax.block_until_ready(forward(images, packed))

    assert out.shape == (BATCH, NUM_PATCHES, HIDDEN), out.shape
    assert out.dtype == images.dtype
    assert bool(jnp.all(jnp.isfinite(out)))
    print("KERNEL_OK")
</pallas_src>

<mosaic_0001>
module attributes {stable_mosaic.version = 11 : i64} {
  func.func @_siglip_tower_kernel(%arg0: i32, %arg1: memref<1x4x192xbf16, #tpu.memory_space<vmem>>, %arg2: memref<192x32xbf16, #tpu.memory_space<vmem>>, %arg3: memref<4x32xf32, #tpu.memory_space<vmem>>, %arg4: memref<1x8x96xf32, #tpu.memory_space<vmem>>, %arg5: memref<1x32x96xbf16, #tpu.memory_space<vmem>>, %arg6: memref<1x32x32xbf16, #tpu.memory_space<vmem>>, %arg7: memref<1x32x64xbf16, #tpu.memory_space<vmem>>, %arg8: memref<1x64x32xbf16, #tpu.memory_space<vmem>>, %arg9: memref<1x4x32xf32, #tpu.memory_space<vmem>>, %arg10: memref<4x32xf32, #tpu.memory_space<vmem>>) attributes {dimension_semantics = [#tpu.dimension_semantics<parallel>], iteration_bounds = array<i64: 2>, scalar_prefetch = 0 : i64, scratch_operands = 1 : i64, tpu.core_type = #tpu.core_type<tc>, window_params = [{transform_indices = @transform_0, window_bounds = array<i64: 1, 4, 192>}, {pipeline_mode = #tpu.pipeline_mode<synchronous>, transform_indices = @transform_1, window_bounds = array<i64: 192, 32>}, {pipeline_mode = #tpu.pipeline_mode<synchronous>, transform_indices = @transform_2, window_bounds = array<i64: 4, 32>}, {pipeline_mode = #tpu.pipeline_mode<synchronous>, transform_indices = @transform_3, window_bounds = array<i64: 1, 8, 96>}, {pipeline_mode = #tpu.pipeline_mode<synchronous>, transform_indices = @transform_4, window_bounds = array<i64: 1, 32, 96>}, {pipeline_mode = #tpu.pipeline_mode<synchronous>, transform_indices = @transform_5, window_bounds = array<i64: 1, 32, 32>}, {pipeline_mode = #tpu.pipeline_mode<synchronous>, transform_indices = @transform_6, window_bounds = array<i64: 1, 32, 64>}, {pipeline_mode = #tpu.pipeline_mode<synchronous>, transform_indices = @transform_7, window_bounds = array<i64: 1, 64, 32>}, {transform_indices = @transform_8, window_bounds = array<i64: 1, 4, 32>}]} {
    %c0 = arith.constant 0 : index
    %c0_0 = arith.constant 0 : index
    %c0_1 = arith.constant 0 : index
    %0 = vector.load %arg1[%c0, %c0_0, %c0_1] : memref<1x4x192xbf16, #tpu.memory_space<vmem>>, vector<1x4x192xbf16>
    %1 = vector.shape_cast %0 : vector<1x4x192xbf16> to vector<4x192xbf16>
    %c0_2 = arith.constant 0 : index
    %c0_3 = arith.constant 0 : index
    %2 = vector.load %arg2[%c0_2, %c0_3] : memref<192x32xbf16, #tpu.memory_space<vmem>>, vector<192x32xbf16>
    %cst = arith.constant dense<0.000000e+00> : vector<4x32xf32>
    %3 = tpu.matmul %1, %2, %cst {dimension_numbers = #tpu.dot_dimension_numbers<[1], [0], [0], [1], [0, 0, 1, 1], [], []>} : vector<4x192xbf16>, vector<192x32xbf16>, vector<4x32xf32> -> vector<4x32xf32>
    %c0_4 = arith.constant 0 : index
    %c0_5 = arith.constant 0 : index
    %4 = vector.load %arg3[%c0_4, %c0_5] : memref<4x32xf32, #tpu.memory_space<vmem>>, vector<4x32xf32>
    %5 = arith.addf %3, %4 : vector<4x32xf32>
    %c0_6 = arith.constant 0 : index
    %c0_7 = arith.constant 0 : index
    %c0_8 = arith.constant 0 : index
    %6 = vector.load %arg4[%c0_6, %c0_7, %c0_8] : memref<1x8x96xf32, #tpu.memory_space<vmem>>, vector<1x8x96xf32>
    %7 = vector.shape_cast %6 : vector<1x8x96xf32> to vector<8x96xf32>
    %8 = vector.extract_strided_slice %7 {offsets = [0, 0], sizes = [1, 32], strides = [1, 1]} : vector<8x96xf32> to vector<1x32xf32>
    %9 = vector.extract_strided_slice %7 {offsets = [1, 0], sizes = [1, 32], strides = [1, 1]} : vector<8x96xf32> to vector<1x32xf32>
    %10 = vector.extract_strided_slice %7 {offsets = [2, 0], sizes = [1, 96], strides = [1, 1]} : vector<8x96xf32> to vector<1x96xf32>
    %11 = vector.extract_strided_slice %7 {offsets = [3, 0], sizes = [1, 32], strides = [1, 1]} : vector<8x96xf32> to vector<1x32xf32>
    %12 = vector.extract_strided_slice %7 {offsets = [4, 0], sizes = [1, 32], strides = [1, 1]} : vector<8x96xf32> to vector<1x32xf32>
    %13 = vector.extract_strided_slice %7 {offsets = [5, 0], sizes = [1, 32], strides = [1, 1]} : vector<8x96xf32> to vector<1x32xf32>
    %14 = vector.extract_strided_slice %7 {offsets = [6, 0], sizes = [1, 64], strides = [1, 1]} : vector<8x96xf32> to vector<1x64xf32>
    %15 = vector.extract_strided_slice %7 {offsets = [7, 0], sizes = [1, 32], strides = [1, 1]} : vector<8x96xf32> to vector<1x32xf32>
    %cst_9 = arith.constant dense<0.000000e+00> : vector<4xf32>
    %16 = vector.multi_reduction <add>, %5, %cst_9 [1] : vector<4x32xf32> to vector<4xf32>
    %17 = vector.shape_cast %16 : vector<4xf32> to vector<4x1xf32>
    %cst_10 = arith.constant 3.200000e+01 : f32
    %18 = vector.broadcast %cst_10 : f32 to vector<4x1xf32>
    %19 = arith.divf %17, %18 : vector<4x1xf32>
    %20 = vector.broadcast %19 : vector<4x1xf32> to vector<4x32xf32>
    %21 = arith.subf %5, %20 : vector<4x32xf32>
    %22 = arith.mulf %21, %21 : vector<4x32xf32>
    %cst_11 = arith.constant dense<0.000000e+00> : vector<4xf32>
    %23 = vector.multi_reduction <add>, %22, %cst_11 [1] : vector<4x32xf32> to vector<4xf32>
    %24 = vector.shape_cast %23 : vector<4xf32> to vector<4x1xf32>
    %cst_12 = arith.constant 3.200000e+01 : f32
    %25 = vector.broadcast %cst_12 : f32 to vector<4x1xf32>
    %26 = arith.divf %24, %25 : vector<4x1xf32>
    %cst_13 = arith.constant 9.99999997E-7 : f32
    %27 = vector.broadcast %cst_13 : f32 to vector<4x1xf32>
    %28 = arith.addf %26, %27 : vector<4x1xf32>
    %29 = math.rsqrt %28 : vector<4x1xf32>
    %30 = vector.broadcast %29 : vector<4x1xf32> to vector<4x32xf32>
    %31 = arith.mulf %21, %30 : vector<4x32xf32>
    %32 = vector.broadcast %8 : vector<1x32xf32> to vector<4x32xf32>
    %33 = arith.mulf %31, %32 : vector<4x32xf32>
    %34 = vector.broadcast %9 : vector<1x32xf32> to vector<4x32xf32>
    %35 = arith.addf %33, %34 : vector<4x32xf32>
    %36 = arith.truncf %35 : vector<4x32xf32> to vector<4x32xbf16>
    %c0_14 = arith.constant 0 : index
    %c0_15 = arith.constant 0 : index
    %c0_16 = arith.constant 0 : index
    %37 = vector.load %arg5[%c0_14, %c0_15, %c0_16] : memref<1x32x96xbf16, #tpu.memory_space<vmem>>, vector<1x32x96xbf16>
    %38 = vector.shape_cast %37 : vector<1x32x96xbf16> to vector<32x96xbf16>
    %cst_17 = arith.constant dense<0.000000e+00> : vector<4x96xf32>
    %39 = tpu.matmul %36, %38, %cst_17 {dimension_numbers = #tpu.dot_dimension_numbers<[1], [0], [0], [1], [0, 0, 1, 1], [], []>} : vector<4x32xbf16>, vector<32x96xbf16>, vector<4x96xf32> -> vector<4x96xf32>
    %40 = vector.broadcast %10 : vector<1x96xf32> to vector<4x96xf32>
    %41 = arith.addf %39, %40 : vector<4x96xf32>
    %42 = vector.extract_strided_slice %41 {offsets = [0, 0], sizes = [4, 8], strides = [1, 1]} : vector<4x96xf32> to vector<4x8xf32>
    %43 = vector.extract_strided_slice %41 {offsets = [0, 32], sizes = [4, 8], strides = [1, 1]} : vector<4x96xf32> to vector<4x8xf32>
    %44 = vector.extract_strided_slice %41 {offsets = [0, 64], sizes = [4, 8], strides = [1, 1]} : vector<4x96xf32> to vector<4x8xf32>
    %45 = arith.truncf %42 : vector<4x8xf32> to vector<4x8xbf16>
    %46 = arith.truncf %43 : vector<4x8xf32> to vector<4x8xbf16>
    %cst_18 = arith.constant dense<0.000000e+00> : vector<4x4xf32>
    %47 = tpu.matmul %45, %46, %cst_18 {dimension_numbers = #tpu.dot_dimension_numbers<[1], [1], [0], [0], [0, 0, 1, 0], [], []>} : vector<4x8xbf16>, vector<4x8xbf16>, vector<4x4xf32> -> vector<4x4xf32>
    %cst_19 = arith.constant dense<0xFF800000> : vector<4xf32>
    %48 = vector.multi_reduction <maximumf>, %47, %cst_19 [1] : vector<4x4xf32> to vector<4xf32>
    %49 = vector.shape_cast %48 : vector<4xf32> to vector<4x1xf32>
    %50 = vector.broadcast %49 : vector<4x1xf32> to vector<4x4xf32>
    %51 = arith.subf %47, %50 : vector<4x4xf32>
    %52 = math.exp %51 : vector<4x4xf32>
    %cst_20 = arith.constant dense<0.000000e+00> : vector<4xf32>
    %53 = vector.multi_reduction <add>, %52, %cst_20 [1] : vector<4x4xf32> to vector<4xf32>
    %54 = vector.shape_cast %53 : vector<4xf32> to vector<4x1xf32>
    %55 = tpu.reciprocal %54 {approx = true} : vector<4x1xf32> -> vector<4x1xf32>
    %56 = vector.broadcast %55 : vector<4x1xf32> to vector<4x4xf32>
    %57 = arith.mulf %52, %56 : vector<4x4xf32>
    %58 = arith.truncf %57 : vector<4x4xf32> to vector<4x4xbf16>
    %59 = arith.truncf %44 : vector<4x8xf32> to vector<4x8xbf16>
    %cst_21 = arith.constant dense<0.000000e+00> : vector<4x8xf32>
    %60 = tpu.matmul %58, %59, %cst_21 {dimension_numbers = #tpu.dot_dimension_numbers<[1], [0], [0], [1], [0, 0, 1, 1], [], []>} : vector<4x4xbf16>, vector<4x8xbf16>, vector<4x8xf32> -> vector<4x8xf32>
    %c0_22 = arith.constant 0 : index
    %c0_23 = arith.constant 0 : index
    %61 = vector.load %arg10[%c0_22, %c0_23] : memref<4x32xf32, #tpu.memory_space<vmem>>, vector<4x8xf32>
    tpu.vector_store %arg10[%c0_22, %c0_23], %60 {strides = array<i32>} : memref<4x32xf32, #tpu.memory_space<vmem>>, vector<4x8xf32>,
    %62 = vector.extract_strided_slice %41 {offsets = [0, 8], sizes = [4, 8], strides = [1, 1]} : vector<4x96xf32> to vector<4x8xf32>
    %63 = vector.extract_strided_slice %41 {offsets = [0, 40], sizes = [4, 8], strides = [1, 1]} : vector<4x96xf32> to vector<4x8xf32>
    %64 = vector.extract_strided_slice %41 {offsets = [0, 72], sizes = [4, 8], strides = [1, 1]} : vector<4x96xf32> to vector<4x8xf32>
    %65 = arith.truncf %62 : vector<4x8xf32> to vector<4x8xbf16>
    %66 = arith.truncf %63 : vector<4x8xf32> to vector<4x8xbf16>
    %cst_24 = arith.constant dense<0.000000e+00> : vector<4x4xf32>
    %67 = tpu.matmul %65, %66, %cst_24 {dimension_numbers = #tpu.dot_dimension_numbers<[1], [1], [0], [0], [0, 0, 1, 0], [], []>} : vector<4x8xbf16>, vector<4x8xbf16>, vector<4x4xf32> -> vector<4x4xf32>
    %cst_25 = arith.constant dense<0xFF800000> : vector<4xf32>
    %68 = vector.multi_reduction <maximumf>, %67, %cst_25 [1] : vector<4x4xf32> to vector<4xf32>
    %69 = vector.shape_cast %68 : vector<4xf32> to vector<4x1xf32>
    %70 = vector.broadcast %69 : vector<4x1xf32> to vector<4x4xf32>
    %71 = arith.subf %67, %70 : vector<4x4xf32>
    %72 = math.exp %71 : vector<4x4xf32>
    %cst_26 = arith.constant dense<0.000000e+00> : vector<4xf32>
    %73 = vector.multi_reduction <add>, %72, %cst_26 [1] : vector<4x4xf32> to vector<4xf32>
    %74 = vector.shape_cast %73 : vector<4xf32> to vector<4x1xf32>
    %75 = tpu.reciprocal %74 {approx = true} : vector<4x1xf32> -> vector<4x1xf32>
    %76 = vector.broadcast %75 : vector<4x1xf32> to vector<4x4xf32>
    %77 = arith.mulf %72, %76 : vector<4x4xf32>
    %78 = arith.truncf %77 : vector<4x4xf32> to vector<4x4xbf16>
    %79 = arith.truncf %64 : vector<4x8xf32> to vector<4x8xbf16>
    %cst_27 = arith.constant dense<0.000000e+00> : vector<4x8xf32>
    %80 = tpu.matmul %78, %79, %cst_27 {dimension_numbers = #tpu.dot_dimension_numbers<[1], [0], [0], [1], [0, 0, 1, 1], [], []>} : vector<4x4xbf16>, vector<4x8xbf16>, vector<4x8xf32> -> vector<4x8xf32>
    %c0_28 = arith.constant 0 : index
    %c8 = arith.constant 8 : index
    %81 = vector.load %arg10[%c0_28, %c8] : memref<4x32xf32, #tpu.memory_space<vmem>>, vector<4x8xf32>
    tpu.vector_store %arg10[%c0_28, %c8], %80 {strides = array<i32>} : memref<4x32xf32, #tpu.memory_space<vmem>>, vector<4x8xf32>,
    %82 = vector.extract_strided_slice %41 {offsets = [0, 16], sizes = [4, 8], strides = [1, 1]} : vector<4x96xf32> to vector<4x8xf32>
    %83 = vector.extract_strided_slice %41 {offsets = [0, 48], sizes = [4, 8], strides = [1, 1]} : vector<4x96xf32> to vector<4x8xf32>
    %84 = vector.extract_strided_slice %41 {offsets = [0, 80], sizes = [4, 8], strides = [1, 1]} : vector<4x96xf32> to vector<4x8xf32>
    %85 = arith.truncf %82 : vector<4x8xf32> to vector<4x8xbf16>
    %86 = arith.truncf %83 : vector<4x8xf32> to vector<4x8xbf16>
    %cst_29 = arith.constant dense<0.000000e+00> : vector<4x4xf32>
    %87 = tpu.matmul %85, %86, %cst_29 {dimension_numbers = #tpu.dot_dimension_numbers<[1], [1], [0], [0], [0, 0, 1, 0], [], []>} : vector<4x8xbf16>, vector<4x8xbf16>, vector<4x4xf32> -> vector<4x4xf32>
    %cst_30 = arith.constant dense<0xFF800000> : vector<4xf32>
    %88 = vector.multi_reduction <maximumf>, %87, %cst_30 [1] : vector<4x4xf32> to vector<4xf32>
    %89 = vector.shape_cast %88 : vector<4xf32> to vector<4x1xf32>
    %90 = vector.broadcast %89 : vector<4x1xf32> to vector<4x4xf32>
    %91 = arith.subf %87, %90 : vector<4x4xf32>
    %92 = math.exp %91 : vector<4x4xf32>
    %cst_31 = arith.constant dense<0.000000e+00> : vector<4xf32>
    %93 = vector.multi_reduction <add>, %92, %cst_31 [1] : vector<4x4xf32> to vector<4xf32>
    %94 = vector.shape_cast %93 : vector<4xf32> to vector<4x1xf32>
    %95 = tpu.reciprocal %94 {approx = true} : vector<4x1xf32> -> vector<4x1xf32>
    %96 = vector.broadcast %95 : vector<4x1xf32> to vector<4x4xf32>
    %97 = arith.mulf %92, %96 : vector<4x4xf32>
    %98 = arith.truncf %97 : vector<4x4xf32> to vector<4x4xbf16>
    %99 = arith.truncf %84 : vector<4x8xf32> to vector<4x8xbf16>
    %cst_32 = arith.constant dense<0.000000e+00> : vector<4x8xf32>
    %100 = tpu.matmul %98, %99, %cst_32 {dimension_numbers = #tpu.dot_dimension_numbers<[1], [0], [0], [1], [0, 0, 1, 1], [], []>} : vector<4x4xbf16>, vector<4x8xbf16>, vector<4x8xf32> -> vector<4x8xf32>
    %c0_33 = arith.constant 0 : index
    %c16 = arith.constant 16 : index
    %101 = vector.load %arg10[%c0_33, %c16] : memref<4x32xf32, #tpu.memory_space<vmem>>, vector<4x8xf32>
    tpu.vector_store %arg10[%c0_33, %c16], %100 {strides = array<i32>} : memref<4x32xf32, #tpu.memory_space<vmem>>, vector<4x8xf32>,
    %102 = vector.extract_strided_slice %41 {offsets = [0, 24], sizes = [4, 8], strides = [1, 1]} : vector<4x96xf32> to vector<4x8xf32>
    %103 = vector.extract_strided_slice %41 {offsets = [0, 56], sizes = [4, 8], strides = [1, 1]} : vector<4x96xf32> to vector<4x8xf32>
    %104 = vector.extract_strided_slice %41 {offsets = [0, 88], sizes = [4, 8], strides = [1, 1]} : vector<4x96xf32> to vector<4x8xf32>
    %105 = arith.truncf %102 : vector<4x8xf32> to vector<4x8xbf16>
    %106 = arith.truncf %103 : vector<4x8xf32> to vector<4x8xbf16>
    %cst_34 = arith.constant dense<0.000000e+00> : vector<4x4xf32>
    %107 = tpu.matmul %105, %106, %cst_34 {dimension_numbers = #tpu.dot_dimension_numbers<[1], [1], [0], [0], [0, 0, 1, 0], [], []>} : vector<4x8xbf16>, vector<4x8xbf16>, vector<4x4xf32> -> vector<4x4xf32>
    %cst_35 = arith.constant dense<0xFF800000> : vector<4xf32>
    %108 = vector.multi_reduction <maximumf>, %107, %cst_35 [1] : vector<4x4xf32> to vector<4xf32>
    %109 = vector.shape_cast %108 : vector<4xf32> to vector<4x1xf32>
    %110 = vector.broadcast %109 : vector<4x1xf32> to vector<4x4xf32>
    %111 = arith.subf %107, %110 : vector<4x4xf32>
    %112 = math.exp %111 : vector<4x4xf32>
    %cst_36 = arith.constant dense<0.000000e+00> : vector<4xf32>
    %113 = vector.multi_reduction <add>, %112, %cst_36 [1] : vector<4x4xf32> to vector<4xf32>
    %114 = vector.shape_cast %113 : vector<4xf32> to vector<4x1xf32>
    %115 = tpu.reciprocal %114 {approx = true} : vector<4x1xf32> -> vector<4x1xf32>
    %116 = vector.broadcast %115 : vector<4x1xf32> to vector<4x4xf32>
    %117 = arith.mulf %112, %116 : vector<4x4xf32>
    %118 = arith.truncf %117 : vector<4x4xf32> to vector<4x4xbf16>
    %119 = arith.truncf %104 : vector<4x8xf32> to vector<4x8xbf16>
    %cst_37 = arith.constant dense<0.000000e+00> : vector<4x8xf32>
    %120 = tpu.matmul %118, %119, %cst_37 {dimension_numbers = #tpu.dot_dimension_numbers<[1], [0], [0], [1], [0, 0, 1, 1], [], []>} : vector<4x4xbf16>, vector<4x8xbf16>, vector<4x8xf32> -> vector<4x8xf32>
    %c0_38 = arith.constant 0 : index
    %c24 = arith.constant 24 : index
    %121 = vector.load %arg10[%c0_38, %c24] : memref<4x32xf32, #tpu.memory_space<vmem>>, vector<4x8xf32>
    tpu.vector_store %arg10[%c0_38, %c24], %120 {strides = array<i32>} : memref<4x32xf32, #tpu.memory_space<vmem>>, vector<4x8xf32>,
    %122 = vector.broadcast %11 : vector<1x32xf32> to vector<4x32xf32>
    %123 = arith.addf %5, %122 : vector<4x32xf32>
    %c0_39 = arith.constant 0 : index
    %c0_40 = arith.constant 0 : index
    %124 = vector.load %arg10[%c0_39, %c0_40] : memref<4x32xf32, #tpu.memory_space<vmem>>, vector<4x32xf32>
    %125 = arith.truncf %124 : vector<4x32xf32> to vector<4x32xbf16>
    %c0_41 = arith.constant 0 : index
    %c0_42 = arith.constant 0 : index
    %c0_43 = arith.constant 0 : index
    %126 = vector.load %arg6[%c0_41, %c0_42, %c0_43] : memref<1x32x32xbf16, #tpu.memory_space<vmem>>, vector<1x32x32xbf16>
    %127 = vector.shape_cast %126 : vector<1x32x32xbf16> to vector<32x32xbf16>
    %cst_44 = arith.constant dense<0.000000e+00> : vector<4x32xf32>
    %128 = tpu.matmul %125, %127, %cst_44 {dimension_numbers = #tpu.dot_dimension_numbers<[1], [0], [0], [1], [0, 0, 1, 1], [], []>} : vector<4x32xbf16>, vector<32x32xbf16>, vector<4x32xf32> -> vector<4x32xf32>
    %129 = arith.addf %123, %128 : vector<4x32xf32>
    %cst_45 = arith.constant dense<0.000000e+00> : vector<4xf32>
    %130 = vector.multi_reduction <add>, %129, %cst_45 [1] : vector<4x32xf32> to vector<4xf32>
    %131 = vector.shape_cast %130 : vector<4xf32> to vector<4x1xf32>
    %cst_46 = arith.constant 3.200000e+01 : f32
    %132 = vector.broadcast %cst_46 : f32 to vector<4x1xf32>
    %133 = arith.divf %131, %132 : vector<4x1xf32>
    %134 = vector.broadcast %133 : vector<4x1xf32> to vector<4x32xf32>
    %135 = arith.subf %129, %134 : vector<4x32xf32>
    %136 = arith.mulf %135, %135 : vector<4x32xf32>
    %cst_47 = arith.constant dense<0.000000e+00> : vector<4xf32>
    %137 = vector.multi_reduction <add>, %136, %cst_47 [1] : vector<4x32xf32> to vector<4xf32>
    %138 = vector.shape_cast %137 : vector<4xf32> to vector<4x1xf32>
    %cst_48 = arith.constant 3.200000e+01 : f32
    %139 = vector.broadcast %cst_48 : f32 to vector<4x1xf32>
    %140 = arith.divf %138, %139 : vector<4x1xf32>
    %cst_49 = arith.constant 9.99999997E-7 : f32
    %141 = vector.broadcast %cst_49 : f32 to vector<4x1xf32>
    %142 = arith.addf %140, %141 : vector<4x1xf32>
    %143 = math.rsqrt %142 : vector<4x1xf32>
    %144 = vector.broadcast %143 : vector<4x1xf32> to vector<4x32xf32>
    %145 = arith.mulf %135, %144 : vector<4x32xf32>
    %146 = vector.broadcast %12 : vector<1x32xf32> to vector<4x32xf32>
    %147 = arith.mulf %145, %146 : vector<4x32xf32>
    %148 = vector.broadcast %13 : vector<1x32xf32> to vector<4x32xf32>
    %149 = arith.addf %147, %148 : vector<4x32xf32>
    %150 = arith.truncf %149 : vector<4x32xf32> to vector<4x32xbf16>
    %c0_50 = arith.constant 0 : index
    %c0_51 = arith.constant 0 : index
    %c0_52 = arith.constant 0 : index
    %151 = vector.load %arg7[%c0_50, %c0_51, %c0_52] : memref<1x32x64xbf16, #tpu.memory_space<vmem>>, vector<1x32x64xbf16>
    %152 = vector.shape_cast %151 : vector<1x32x64xbf16> to vector<32x64xbf16>
    %cst_53 = arith.constant dense<0.000000e+00> : vector<4x64xf32>
    %153 = tpu.matmul %150, %152, %cst_53 {dimension_numbers = #tpu.dot_dimension_numbers<[1], [0], [0], [1], [0, 0, 1, 1], [], []>} : vector<4x32xbf16>, vector<32x64xbf16>, vector<4x64xf32> -> vector<4x64xf32>
    %154 = vector.broadcast %14 : vector<1x64xf32> to vector<4x64xf32>
    %155 = arith.addf %153, %154 : vector<4x64xf32>
    %cst_54 = arith.constant 5.000000e-01 : f32
    %156 = vector.broadcast %cst_54 : f32 to vector<4x64xf32>
    %157 = arith.mulf %156, %155 : vector<4x64xf32>
    %cst_55 = arith.constant 4.471500e-02 : f32
    %158 = vector.broadcast %cst_55 : f32 to vector<4x64xf32>
    %159 = arith.mulf %158, %155 : vector<4x64xf32>
    %160 = arith.mulf %159, %155 : vector<4x64xf32>
    %161 = arith.mulf %160, %155 : vector<4x64xf32>
    %162 = arith.addf %155, %161 : vector<4x64xf32>
    %cst_56 = arith.constant 0.797884583 : f32
    %163 = vector.broadcast %cst_56 : f32 to vector<4x64xf32>
    %164 = arith.mulf %163, %162 : vector<4x64xf32>
    %165 = math.tanh %164 : vector<4x64xf32>
    %cst_57 = arith.constant 1.000000e+00 : f32
    %166 = vector.broadcast %cst_57 : f32 to vector<4x64xf32>
    %167 = arith.addf %166, %165 : vector<4x64xf32>
    %168 = arith.mulf %157, %167 : vector<4x64xf32>
    %169 = vector.broadcast %15 : vector<1x32xf32> to vector<4x32xf32>
    %170 = arith.addf %129, %169 : vector<4x32xf32>
    %171 = arith.truncf %168 : vector<4x64xf32> to vector<4x64xbf16>
    %c0_58 = arith.constant 0 : index
    %c0_59 = arith.constant 0 : index
    %c0_60 = arith.constant 0 : index
    %172 = vector.load %arg8[%c0_58, %c0_59, %c0_60] : memref<1x64x32xbf16, #tpu.memory_space<vmem>>, vector<1x64x32xbf16>
    %173 = vector.shape_cast %172 : vector<1x64x32xbf16> to vector<64x32xbf16>
    %cst_61 = arith.constant dense<0.000000e+00> : vector<4x32xf32>
    %174 = tpu.matmul %171, %173, %cst_61 {dimension_numbers = #tpu.dot_dimension_numbers<[1], [0], [0], [1], [0, 0, 1, 1], [], []>} : vector<4x64xbf16>, vector<64x32xbf16>, vector<4x32xf32> -> vector<4x32xf32>
    %175 = arith.addf %170, %174 : vector<4x32xf32>
    %c0_62 = arith.constant 0 : index
    %c0_63 = arith.constant 0 : index
    %c0_64 = arith.constant 0 : index
    %176 = vector.load %arg9[%c0_62, %c0_63, %c0_64] : memref<1x4x32xf32, #tpu.memory_space<vmem>>, vector<1x4x32xf32>
    %177 = vector.shape_cast %176 : vector<1x4x32xf32> to vector<4x32xf32>
    %178 = vector.shape_cast %175 : vector<4x32xf32> to vector<1x4x32xf32>
    tpu.vector_store %arg9[%c0_62, %c0_63, %c0_64], %178 {strides = array<i32>} : memref<1x4x32xf32, #tpu.memory_space<vmem>>, vector<1x4x32xf32>,
    return
  }
  func.func @transform_0(%arg0: i32) -> (i32, i32, i32) {
    %c0_i32 = arith.constant 0 : i32
    %c0_i32_0 = arith.constant 0 : i32
    %c0_i32_1 = arith.constant 0 : i32
    return %arg0, %c0_i32, %c0_i32_0 : i32, i32, i32
  }
  func.func @transform_1(%arg0: i32) -> (i32, i32) {
    %c0_i32 = arith.constant 0 : i32
    %c0_i32_0 = arith.constant 0 : i32
    %c0_i32_1 = arith.constant 0 : i32
    return %c0_i32, %c0_i32_0 : i32, i32
  }
  func.func @transform_2(%arg0: i32) -> (i32, i32) {
    %c0_i32 = arith.constant 0 : i32
    %c0_i32_0 = arith.constant 0 : i32
    %c0_i32_1 = arith.constant 0 : i32
    return %c0_i32, %c0_i32_0 : i32, i32
  }
  func.func @transform_3(%arg0: i32) -> (i32, i32, i32) {
    %c0_i32 = arith.constant 0 : i32
    %c0_i32_0 = arith.constant 0 : i32
    %c0_i32_1 = arith.constant 0 : i32
    %c0_i32_2 = arith.constant 0 : i32
    return %c0_i32, %c0_i32_0, %c0_i32_1 : i32, i32, i32
  }
  func.func @transform_4(%arg0: i32) -> (i32, i32, i32) {
    %c0_i32 = arith.constant 0 : i32
    %c0_i32_0 = arith.constant 0 : i32
    %c0_i32_1 = arith.constant 0 : i32
    %c0_i32_2 = arith.constant 0 : i32
    return %c0_i32, %c0_i32_0, %c0_i32_1 : i32, i32, i32
  }
  func.func @transform_5(%arg0: i32) -> (i32, i32, i32) {
    %c0_i32 = arith.constant 0 : i32
    %c0_i32_0 = arith.constant 0 : i32
    %c0_i32_1 = arith.constant 0 : i32
    %c0_i32_2 = arith.constant 0 : i32
    return %c0_i32, %c0_i32_0, %c0_i32_1 : i32, i32, i32
  }
  func.func @transform_6(%arg0: i32) -> (i32, i32, i32) {
    %c0_i32 = arith.constant 0 : i32
    %c0_i32_0 = arith.constant 0 : i32
    %c0_i32_1 = arith.constant 0 : i32
    %c0_i32_2 = arith.constant 0 : i32
    return %c0_i32, %c0_i32_0, %c0_i32_1 : i32, i32, i32
  }
  func.func @transform_7(%arg0: i32) -> (i32, i32, i32) {
    %c0_i32 = arith.constant 0 : i32
    %c0_i32_0 = arith.constant 0 : i32
    %c0_i32_1 = arith.constant 0 : i32
    %c0_i32_2 = arith.constant 0 : i32
    return %c0_i32, %c0_i32_0, %c0_i32_1 : i32, i32, i32
  }
  func.func @transform_8(%arg0: i32) -> (i32, i32, i32) {
    %c0_i32 = arith.constant 0 : i32
    %c0_i32_0 = arith.constant 0 : i32
    %c0_i32_1 = arith.constant 0 : i32
    return %arg0, %c0_i32, %c0_i32_0 : i32, i32, i32
  }
}

</mosaic_0001>

<bundles_post_ra>
// kernel: siglip_vision_tower_forward.1
= control target key start
LH: loop header
LB: loop body
LE: loop exit
PB: predicated region body
PF: predicated region fallthrough
CT: control target
= control target key end

     0   :  { %13 = vsyncpa [#allocation4], 0  ;;  %s2012_s0 = inlined_call_operand.vmem [shape: bf16[2,4,192], index: 0, kind: input, shape index: {}]   ;;  %s2013_s1 = inlined_call_operand.vmem [shape: bf16[192,32], index: 1, kind: input, shape index: {}]   ;;  %s2014_s2 = inlined_call_operand.vmem [shape: f32[4,32], index: 2, kind: input, shape index: {}]   ;;  %s2015_s3 = inlined_call_operand.vmem [shape: f32[1,8,96], index: 3, kind: input, shape index: {}]   ;;  %s2016_s4 = inlined_call_operand.vmem [shape: bf16[1,32,96], index: 4, kind: input, shape index: {}]   ;;  %s2017_s5 = inlined_call_operand.vmem [shape: bf16[1,32,32], index: 5, kind: input, shape index: {}]   ;;  %s2018_s6 = inlined_call_operand.vmem [shape: bf16[1,32,64], index: 6, kind: input, shape index: {}]   ;;  %s2019_s7 = inlined_call_operand.vmem [shape: bf16[1,64,32], index: 7, kind: input, shape index: {}]   ;;  %s2020_s8 = inlined_call_operand.hbm [shape: f32[2,4,32], index: 8, kind: output, shape index: {}]  }
   0x1   :  { %15 = vsyncpa [#allocation4 + $0x1], 0  ;;  %s1720_s27 = smov 0   ;;  %s1722_s28 = smov 0  }
   0x2   :  { %s1724_s29 = smov 0   ;;  %s1726_s30 = smov 0  }
   0x3 LB: > { %s1741_s9 = sadd.s32 4294967295, %s1655_s30   ;;  %s1331_s10 = sadd.s32 4294967294, %s1655_s30   ;;  %s1655_s30 = sphi %s1726_s30, %s2026_s30   ;;  %s1651_s29 = sphi %s1724_s29, %s2025_s29   ;;  %s1647_s28 = sphi %s1722_s28, %s2024_s28   ;;  %s1643_s27 = sphi %s1720_s27, %s2023_s27  }
   0x4   : > { %s1745_s11 = sadd.s32 1, %s1655_s30   ;;  %s201_s12 = sadd.s32 1, %s1651_s29 }
   0x5   : > { %s198_s13 = ssub.s32 %s1655_s30, %s1745_s11  ;;  %p211_p0 = scmp.ne.s32.totalorder %s1651_s29, %s1647_s28 }
   0x6   : > { %p199_p1 = scmp.eq.s32.totalorder %s198_s13, 0  ;;  %p212_p2 = scmp.eq.s32.totalorder %s1741_s9, 1 }
   0x7   : > { %p217_p3 = scmp.ne.s32.totalorder %s1647_s28, %s1643_s27  ;;  %p218_p4 = scmp.eq.s32.totalorder %s1331_s10, 1 }
   0x8   : > { %s1756_s14 = scalar_select %p199_p1, %s1651_s29, %s201_s12  }
   0x9   : > { %p1758_p5 = por %p212_p2, %p211_p0  ;;  %p1762_p6 = por %p218_p4, %p217_p3 }
   0xa   : > { %p1334_p7 = scmp.ge.s32.totalorder %s1655_s30, 1  ;;  %p265_p8 = scmp.lt.s32.totalorder %s1655_s30, 3 }
   0xc   : > { %p266_p9 = pnand %p1334_p7, %p265_p8 }
   0xd   : > { %v1549_v0 = vld [vmem:[%s2013_s1] sm:$0xff] (!%p266_p9)   ;;  %v1657_v1 = vmov (!%p266_p9), 0   ;;  %p299_p10 = scmp.lt.s32.totalorder (!%p266_p9), %s1741_s9, 1  ;;  %v1550_v2 = vld [vmem:[%s2013_s1 + $0x8] sm:$0xff] (!%p266_p9)   ;;  %v1551_v3 = vld [vmem:[%s2013_s1 + $0x10] sm:$0xff] (!%p266_p9)   ;;  %vm413_vm0 = vcmask (!%p266_p9), 523264   ;;  %v473_v33 = vlaneseq (!%p266_p9) }
   0xe   : > { %269 = sbr.rel (%p266_p9) target bundleno = 3874 (0xf22), region = 52  ;;  %417 = vmatprep.subr.bf16.mxu0 (!%p266_p9), %v1657_v1  ;;  %v1552_v4 = vld [vmem:[%s2013_s1 + $0x18] sm:$0xff] (!%p266_p9)   ;;  %v1553_v5 = vld [vmem:[%s2013_s1 + $0x20] sm:$0xff] (!%p266_p9)   ;;  %v1554_v8 = vld [vmem:[%s2013_s1 + $0x28] sm:$0xff] (!%p266_p9)   ;;  %vm458_vm1 = vcmask (!%p266_p9), 257024   ;;  %v1658_v28 = vmov (!%p266_p9), 0.0  }
   0xf   : > { %418 = vmatpush1.bf16.msra.mxu0 (!%p266_p9), %v1549_v0  ;;  %v1555_v9 = vld [vmem:[%s2013_s1 + $0x30] sm:$0xff] (!%p266_p9)   ;;  %v1556_v10 = vld [vmem:[%s2013_s1 + $0x38] sm:$0xff] (!%p266_p9)   ;;  %v1557_v11 = vld [vmem:[%s2013_s1 + $0x40] sm:$0xff] (!%p266_p9)   ;;  %1409 = vmatprep.subr.bf16.mxu1 (!%p266_p9), %v1658_v28  ;;  %vm1659_vm2 = vmmov (!%p266_p9), 0   ;;  %v1833_v34 = vshrl.u32 (!%p266_p9), %v473_v33, 7  ;;  %vm504_vm3 = vcmask (!%p266_p9), 261120  }
  0x10   : > { %419 = vmatprep.subr.bf16.mxu0 (!%p266_p9), %v1657_v1  ;;  %v1558_v12 = vld [vmem:[%s2013_s1 + $0x48] sm:$0xff] (!%p266_p9)   ;;  %v1559_v13 = vld [vmem:[%s2013_s1 + $0x50] sm:$0xff] (!%p266_p9)   ;;  %v1560_v14 = vld [vmem:[%s2013_s1 + $0x58] sm:$0xff] (!%p266_p9)   ;;  %1413 = vmatprep.mubr.msk.bf16.mxu1 (!%p266_p9), %vm1659_vm2, %v1658_v28  ;;  %s1660_s12 = smov (!%p266_p9), 64   ;;  %s1661_s13 = smov (!%p266_p9), 96   ;;  %vm552_vm4 = vcmask (!%p266_p9), 64512  }
  0x11   : > { %v330_v15 = vld [vmem:[%s2014_s2] sm:$0xf] (!%p266_p9)  ;;  %v1562_v29 = vld [vmem:[%s2016_s4 + $0x8] sm:$0xff] (!%p266_p9)   ;;  %v475_v35 = vsub.s32 (!%p266_p9), 0, %v1833_v34  ;;  %v480_v36 = vsub.s32 (!%p266_p9), 1, %v1833_v34  ;;  %v490_v45 = vsub.s32 (!%p266_p9), 2, %v1833_v34 }
  0x12   : > { %v1561_v27 = vld [vmem:[%s2016_s4] sm:$0xff] (!%p266_p9)   ;;  %vm618_vm5 = vcmask (!%p266_p9), 1041408   ;;  %vm599_vm6 = vcmask (!%p266_p9), 27648   ;;  %s1662_s17 = smov (!%p266_p9), 88   ;;  %s1663_s18 = smov (!%p266_p9), 120   ;;  %vm614_vm7 = vcmask (!%p266_p9), 31744  }
  0x13   : > { %420 = vmatpush1.bf16.msra.mxu0 (!%p266_p9), %v1550_v2  ;;  %1410 = vmatpush3.bf16.msra.mxu1 (!%p266_p9), %v1561_v27  ;;  %v1840_v37 = vld [vmem:[%s2015_s3] sm:$0xff] (!%p266_p9)  ;;  %vm662_vm8 = vcmask (!%p266_p9), 60416   ;;  %s1664_s19 = smov (!%p266_p9), 56   ;;  %s1665_s20 = smov (!%p266_p9), 80   ;;  %vm778_vm9 = vcmask (!%p266_p9), 126016   ;;  %vm894_vm10 = vcmask (!%p266_p9), 191616  }
  0x14   : > { %421 = vmatprep.subr.bf16.mxu0 (!%p266_p9), %v1657_v1  ;;  %1411 = vmatprep.subr.bf16.mxu1 (!%p266_p9), %v1658_v28  ;;  %v476_v38 = vrot.slane (!%p266_p9), %v1840_v37, %v475_v35  ;;  %v481_v41 = vrot.slane (!%p266_p9), %v1840_v37, %v480_v36  ;;  %v491_v46 = vrot.slane (!%p266_p9), %v1840_v37, %v490_v45  ;;  %s1667_s22 = smov (!%p266_p9), 72   ;;  %s1668_s23 = smov (!%p266_p9), 104   ;;  %vm1010_vm11 = vcmask (!%p266_p9), 257216  }
  0x15   : > { %s300_s21 = scalar_select %p299_p10, %s1741_s9, 1 }
  0x16   : > { %s1670_s25 = smov 48   ;;  %s1671_s26 = smov 8  }
  0x17   : > { %s1378_s24 = sshll.u32 %s300_s21, 2  ;;  %422 = vmatpush1.bf16.msra.mxu0 %v1551_v3  ;;  %1412 = vmatpush3.bf16.msra.mxu1 %v1562_v29  ;;  %s1666_s21 = smov 112  }
  0x18   : > { %s303_s10 = scalar_lea.vmem %s2012_s0, %s1378_s24  ;;  %423 = vmatprep.subr.bf16.mxu0 %v1657_v1  ;;  %1417 = vmatprep.subr.bf16.mxu1 %v1658_v28  ;;  %s1669_s24 = smov 40  }
  0x19   : > { %v1338_v6 = vld.sshfl [vmem:[%s303_s10] sm:$0x33 pattern:$0x76325410] }
  0x1a   : > { %v339_v7 = vcombine.high %v1338_v6, %v1338_v6 }
  0x1b   : > { %424 = vmatpush1.bf16.msra.mxu0 %v1552_v4 }
  0x1c   : > { %425 = vmatprep.subr.bf16.mxu0 %v1657_v1  ;;  %1351 = vmatprep.mubr.msk.bf16.mxu0 %vm413_vm0, %v339_v7 }
  0x1f   : > { %426 = vmatpush1.bf16.msra.mxu0 %v1553_v5 }
  0x20   : > { %427 = vmatprep.subr.bf16.mxu0 %v1657_v1 }
  0x23   : > { %428 = vmatpush1.bf16.msra.mxu0 %v1554_v8 }
  0x24   : > { %429 = vmatprep.subr.bf16.mxu0 %v1657_v1 }
  0x27   : > { %430 = vmatpush1.bf16.msra.mxu0 %v1555_v9 }
  0x28   : > { %431 = vmatprep.subr.bf16.mxu0 %v1657_v1 }
  0x2b   : > { %432 = vmatpush1.bf16.msra.mxu0 %v1556_v10 }
  0x2c   : > { %433 = vmatprep.subr.bf16.mxu0 %v1657_v1 }
  0x2f   : > { %434 = vmatpush1.bf16.msra.mxu0 %v1557_v11 }
  0x30   : > { %435 = vmatprep.subr.bf16.mxu0 %v1657_v1 }
  0x33   : > { %436 = vmatpush1.bf16.msra.mxu0 %v1558_v12 }
  0x34   : > { %437 = vmatprep.subr.bf16.mxu0 %v1657_v1 }
  0x37   : > { %438 = vmatpush1.bf16.msra.mxu0 %v1559_v13 }
  0x38   : > { %439 = vmatprep.subr.bf16.mxu0 %v1657_v1 }
  0x3b   : > { %440 = vmatpush1.bf16.msra.mxu0 %v1560_v14 }
  0x3c   : > { %1447 = vmatprep.subr.bf16.mxu0 %v1658_v28 }
  0x3e   : > { %450 = vmatmul.mubr.bf16.vlgmr.msra.gmra.mrb[0].mxu0 %v1338_v6 }
  0x3f   : > { %1449 = vmatprep.mubr.msk.bf16.mxu0 %vm1659_vm2, %v1658_v28 }
 0x111   : > { %v451_v16 = vpop.f32.mrb[0].mxu0 }
 0x112   : > { %v1813_v17 = vadd.f32 %v451_v16, %v330_v15  ;;  %v453_v18 = vpop.f32.mrb[1].mxu0 }
 0x113   : > { %v454_v19 = vpop.f32.mrb[2].mxu0 }
 0x114   : > { %v455_v20 = vpop.f32.mrb[3].mxu0  ;;  %v459_v21 = vsel %vm458_vm1, %v1813_v17, 0.0 }
 0x115   : > { %460 = vadd.xlane.f32.xlu0 %v459_v21 }
 0x1a2   : > { %v461_v22 = vpop.xlane.xlu0 %460 }
 0x1a3   : > { %v463_v23 = vmul.f32 0.03125, %v461_v22 }
 0x1a5   : > { %v464_v24 = vsub.f32 %v1813_v17, %v463_v23 }
 0x1a7   : > { %v465_v25 = vmul.f32 %v464_v24, %v464_v24 }
 0x1a9   : > { %v466_v26 = vsel %vm458_vm1, %v465_v25, 0.0 }
 0x1aa   : > { %467 = vadd.xlane.f32.xlu0 %v466_v26 }
 0x237   : > { %v468_v30 = vpop.xlane.xlu0 %467 }
 0x238   : > { %v469_v31 = vmul.f32 0.03125, %v468_v30 }
 0x23a   : > { %v470_v32 = vadd.f32 1e-06, %v469_v31 }
 0x23c   : > { %1571 = vrsqrt.f32 %v470_v32 }
 0x246   : > { %v1572_v39 = vpop.eup %1571 }
 0x247   : > { %v472_v40 = vmul.f32 %v1572_v39, %v464_v24 }
 0x249   : > { %v477_v42 = vmul.f32 %v476_v38, %v472_v40 }
 0x24b   : > { %v482_v43 = vadd.f32 %v481_v41, %v477_v42 }
 0x24d   : > { %v483_v44 = vpack.c.bf16 %v482_v43, %v482_v43 }
 0x24f   : > { %1414 = vmatmul.mubr.msk.bf16.vlgmr.msra.gmra.mrb[0].mxu1 %vm504_vm3, %v483_v44 }
 0x250   : > { %1419 = vmatprep.mubr.msk.bf16.mxu1 %vm1659_vm2, %v1658_v28 }
 0x322   : > { %v542_v47 = vpop.f32.mrb[0].mxu1 }
 0x323   : > { %v543_v48 = vadd.f32 %v542_v47, %v491_v46  ;;  %v1415_v49 = vpop.f32.mrb[1].mxu1 }
 0x324   : > { %v545_v50 = vpop.f32.mrb[2].mxu1 }
 0x325   : > { %v1849_v51 = vpack.c.bf16 %v543_v48, %v543_v48  ;;  %v1416_v52 = vpop.f32.mrb[3].mxu1 }
 0x327   : > { %612 = vrot.lane.b32.xlu0 %v1849_v51, %s1660_s12  ;;  %550 = vrot.lane.b32.xlu1 %v1849_v51, %s1661_s13  ;;  %s1674_s12 = smov [#allocation3]  }
 0x328   : > { %s1597_s13 = sshll.u32 %s1674_s12, 4  ;;  %s1598_s13 = int_to_ptr.vmem [resolvable:$false] %s1597_s13 }
 0x399   : > { %v551_v53 = vpop.permute.xlu1 %550  ;;  %v613_v55 = vpop.permute.xlu0 %612 }
 0x39a   : > { %v557_v54 = vsel %vm552_vm4, %v551_v53, 0  ;;  %v620_v56 = vsel %vm618_vm5, %v613_v55, 0 }
 0x39b   : > { %1418 = vmatpush3.bf16.xpose.msra.mxu1 %v557_v54 }
 0x39c   : > { %1423 = vmatprep.subr.bf16.mxu1 %v1658_v28 }
 0x3a2   : > { %1420 = vmatmul.mubr.msk.bf16.vlgmr.msra.gmra.mrb[4].mxu1 %vm552_vm4, %v1849_v51 }
 0x3a3   : > { %1424 = vmatpush3.bf16.msra.mxu1 %v620_v56  ;;  %1425 = vmatprep.mubr.msk.bf16.mxu1 %vm1659_vm2, %v1658_v28 }
 0x3a4   : > { %1429 = vmatprep.subr.bf16.mxu1 %v1658_v28 }
 0x475   : > { %v593_v57 = vpop.f32.mrb[4].mxu1 }
 0x476   : > { %v1421_v58 = vpop.f32.mrb[5].mxu1  ;;  %v600_v59 = vsel %vm599_vm6, %v593_v57, -inf }
 0x477   : > { %601 = vmax.xlane.f32.xlu1 %v600_v59  ;;  %v596_v60 = vpop.f32.mrb[6].mxu1 }
 0x478   : > { %v1422_v61 = vpop.f32.mrb[7].mxu1 }
 0x504   : > { %v602_v62 = vpop.xlane.xlu1 %601 }
 0x505   : > { %v603_v63 = vsub.f32 %v593_v57, %v602_v62 }
 0x507   : > { %v604_v0 = vmul.f32 1.442695, %v603_v63 }
 0x509   : > { %1573 = vpow2.f32 %v604_v0 }
 0x513   : > { %v1574_v1 = vpop.eup %1573 }
 0x514   : > { %v606_v2 = vsel %vm599_vm6, %v1574_v1, 0.0 }
 0x515   : > { %607 = vadd.xlane.f32.xlu0 %v606_v2 }
 0x52b   : > { %666 = vrot.lane.b32.xlu0 %v1849_v51, %s1662_s17  ;;  %s1599_s17 = scalar_lea.vmem %s1598_s13, 128 }
 0x52f   : > { %664 = vrot.lane.b32.xlu0 %v1849_v51, %s1663_s18  ;;  %s1672_s18 = smov 16  }
 0x5a2   : > { %v608_v3 = vpop.xlane.xlu0 %607 }
 0x5a3   : > { %1575 = vrcp.f32 %v608_v3 }
 0x5a6   : > { %v667_v6 = vpop.permute.xlu0 %666 }
 0x5a7   : > { %v672_v8 = vsel %vm552_vm4, %v667_v6, 0 }
 0x5aa   : > { %v665_v9 = vpop.permute.xlu0 %664 }
 0x5ad   : > { %v1576_v4 = vpop.eup %1575 }
 0x5ae   : > { %v610_v5 = vmul.f32 %v1576_v4, %v1574_v1 }
 0x5b0   : > { %v611_v7 = vpack.c.bf16 %v610_v5, %v610_v5 }
 0x5b2   : > { %1426 = vmatmul.mubr.msk.bf16.vlgmr.msra.gmra.mrb[8].mxu1 %vm614_vm7, %v611_v7 }
 0x5b3   : > { %1430 = vmatpush3.bf16.xpose.msra.mxu1 %v672_v8  ;;  %1431 = vmatprep.mubr.msk.bf16.mxu1 %vm1659_vm2, %v1658_v28 }
 0x5b4   : > { %1435 = vmatprep.subr.bf16.mxu1 %v1658_v28 }
 0x5ba   : > { %1432 = vmatmul.mubr.msk.bf16.vlgmr.msra.gmra.mrb[12].mxu1 %vm552_vm4, %v665_v9 }
 0x5bb   : > { %1437 = vmatprep.mubr.msk.bf16.mxu1 %vm1659_vm2, %v1658_v28 }
 0x685   : > { %v656_v10 = vpop.f32.mrb[8].mxu1 }
 0x686   : > { %663 = vst.msk [vmem:[#allocation2] sm:$0xf] %vm662_vm8, %v656_v10  ;;  %v1427_v11 = vpop.f32.mrb[9].mxu1 }
 0x687   : > { %v659_v12 = vpop.f32.mrb[10].mxu1 }
 0x688   : > { %v1428_v13 = vpop.f32.mrb[11].mxu1 }
 0x689   : > { %v1563_v13 = vld [vmem:[%s2017_s5] sm:$0xff]  }
 0x68d   : > { %v708_v14 = vpop.f32.mrb[12].mxu1 }
 0x68e   : > { %v1433_v15 = vpop.f32.mrb[13].mxu1  ;;  %v714_v16 = vsel %vm599_vm6, %v708_v14, -inf }
 0x68f   : > { %715 = vmax.xlane.f32.xlu1 %v714_v16  ;;  %v711_v18 = vpop.f32.mrb[14].mxu1 }
 0x690   : > { %v1434_v19 = vpop.f32.mrb[15].mxu1 }
 0x6a0   : > { %726 = vrot.lane.b32.xlu1 %v1849_v51, %s1664_s19  ;;  %s1673_s19 = smov 24  }
 0x6a4   : > { %782 = vrot.lane.b32.xlu1 %v1849_v51, %s1665_s20 }
 0x6a8   : > { %780 = vrot.lane.b32.xlu1 %v1849_v51, %s1666_s21  ;;  %s1375_s21 = sshll.u32 %s1741_s9, 6 }
 0x6ac   : > { %898 = vrot.lane.b32.xlu1 %v1849_v51, %s1667_s22 }
 0x71c   : > { %v716_v20 = vpop.xlane.xlu1 %715 }
 0x71d   : > { %v717_v21 = vsub.f32 %v708_v14, %v716_v20  ;;  %v1564_v14 = vld [vmem:[%s2017_s5 + $0x8] sm:$0xff]  }
 0x71f   : > { %v718_v22 = vmul.f32 1.442695, %v717_v21 }
 0x720   : > { %v727_v23 = vpop.permute.xlu1 %726 }
 0x721   : > { %1577 = vpow2.f32 %v718_v22  ;;  %v732_v24 = vsel %vm618_vm5, %v727_v23, 0 }
 0x722   : > { %1436 = vmatpush3.bf16.msra.mxu1 %v732_v24 }
 0x723   : > { %1441 = vmatprep.subr.bf16.mxu1 %v1658_v28 }
 0x724   : > { %v783_v29 = vpop.permute.xlu1 %782 }
 0x725   : > { %v788_v35 = vsel %vm552_vm4, %v783_v29, 0  ;;  %v1014_v29 = vsub.s32 3, %v1833_v34 }
 0x728   : > { %v781_v33 = vpop.permute.xlu1 %780 }
 0x72b   : > { %v1578_v25 = vpop.eup %1577 }
 0x72c   : > { %v720_v26 = vsel %vm599_vm6, %v1578_v25, 0.0  ;;  %v899_v36 = vpop.permute.xlu1 %898 }
 0x72d   : > { %721 = vadd.xlane.f32.xlu0 %v720_v26  ;;  %v904_v38 = vsel %vm552_vm4, %v899_v36, 0 }
 0x743   : > { %896 = vrot.lane.b32.xlu0 %v1849_v51, %s1668_s23 }
 0x7ba   : > { %v722_v27 = vpop.xlane.xlu0 %721 }
 0x7bb   : > { %1579 = vrcp.f32 %v722_v27 }
 0x7be   : > { %v897_v39 = vpop.permute.xlu0 %896 }
 0x7c5   : > { %v1580_v30 = vpop.eup %1579 }
 0x7c6   : > { %v724_v31 = vmul.f32 %v1580_v30, %v1578_v25  ;;  %v1015_v30 = vrot.slane %v1840_v37, %v1014_v29 }
 0x7c8   : > { %v725_v32 = vpack.c.bf16 %v724_v31, %v724_v31  ;;  %v1016_v31 = vadd.f32 %v1015_v30, %v1813_v17  ;;  %v1565_v17 = vld [vmem:[%s2018_s6] sm:$0xff]  }
 0x7ca   : > { %1438 = vmatmul.mubr.msk.bf16.vlgmr.msra.gmra.mrb[16].mxu1 %vm614_vm7, %v725_v32 }
 0x7cb   : > { %1442 = vmatpush3.bf16.xpose.msra.mxu1 %v788_v35  ;;  %1443 = vmatprep.mubr.msk.bf16.mxu1 %vm1659_vm2, %v1658_v28 }
 0x7cc   : > { %1453 = vmatprep.subr.bf16.mxu1 %v1658_v28 }
 0x7d2   : > { %1444 = vmatmul.mubr.msk.bf16.vlgmr.msra.gmra.mrb[20].mxu1 %vm552_vm4, %v781_v33 }
 0x7d3   : > { %1454 = vmatpush3.bf16.xpose.msra.mxu1 %v904_v38  ;;  %1455 = vmatprep.mubr.msk.bf16.mxu1 %vm1659_vm2, %v1658_v28 }
 0x7d4   : > { %1465 = vmatprep.subr.bf16.mxu1 %v1658_v28 }
 0x7da   : > { %1456 = vmatmul.mubr.msk.bf16.vlgmr.msra.gmra.mrb[24].mxu1 %vm552_vm4, %v897_v39 }
 0x7db   : > { %1469 = vmatprep.mubr.msk.bf16.mxu1 %vm1659_vm2, %v1658_v28  ;;  %1466 = vmatpush3.bf16.msra.mxu1 %v1563_v13 }
 0x7dc   : > { %1467 = vmatprep.subr.bf16.mxu1 %v1658_v28 }
 0x7df   : > { %1468 = vmatpush3.bf16.msra.mxu1 %v1564_v14  ;;  %v1177_v14 = vsub.s32 7, %v1833_v34 }
 0x7e0   : > { %1481 = vmatprep.subr.bf16.mxu1 %v1658_v28 }
 0x89d   : > { %v768_v40 = vpop.f32.mrb[16].mxu1 }
 0x89e   : > { %v1439_v41 = vpop.f32.mrb[17].mxu1 }
 0x89f   : > { %v771_v42 = vpop.f32.mrb[18].mxu1 }
 0x8a0   : > { %v1440_v43 = vpop.f32.mrb[19].mxu1 }
 0x8a5   : > { %v824_v44 = vpop.f32.mrb[20].mxu1 }
 0x8a6   : > { %v1445_v45 = vpop.f32.mrb[21].mxu1  ;;  %v830_v46 = vsel %vm599_vm6, %v824_v44, -inf }
 0x8a7   : > { %831 = vmax.xlane.f32.xlu1 %v830_v46  ;;  %v827_v47 = vpop.f32.mrb[22].mxu1  ;;  %v1566_v45 = vld [vmem:[%s2018_s6 + $0x8] sm:$0xff]  }
 0x8a8   : > { %v1446_v48 = vpop.f32.mrb[23].mxu1 }
 0x8ad   : > { %v940_v49 = vpop.f32.mrb[24].mxu1 }
 0x8ae   : > { %v1457_v50 = vpop.f32.mrb[25].mxu1  ;;  %v946_v52 = vsel %vm599_vm6, %v940_v49, -inf }
 0x8af   : > { %947 = vmax.xlane.f32.xlu0 %v946_v52  ;;  %v943_v53 = vpop.f32.mrb[26].mxu1  ;;  %v1099_v50 = vsub.s32 5, %v1833_v34 }
 0x8b0   : > { %v1458_v54 = vpop.f32.mrb[27].mxu1 }
 0x8c5   : > { %958 = vrot.lane.b32.xlu0 %v1849_v51, %s1669_s24 }
 0x934   : > { %v832_v55 = vpop.xlane.xlu1 %831 }
 0x935   : > { %v833_v56 = vsub.f32 %v824_v44, %v832_v55  ;;  %v1100_v55 = vrot.slane %v1840_v37, %v1099_v50 }
 0x937   : > { %v834_v57 = vmul.f32 1.442695, %v833_v56 }
 0x939   : > { %1581 = vpow2.f32 %v834_v57 }
 0x93c   : > { %v948_v58 = vpop.xlane.xlu0 %947 }
 0x93d   : > { %v949_v59 = vsub.f32 %v940_v49, %v948_v58  ;;  %v1094_v49 = vsub.s32 4, %v1833_v34 }
 0x93f   : > { %v950_v60 = vmul.f32 1.442695, %v949_v59  ;;  %v1095_v52 = vrot.slane %v1840_v37, %v1094_v49  ;;  %v1567_v59 = vld [vmem:[%s2019_s7] sm:$0xff]  }
 0x940   : > { %v959_v7 = vpop.permute.xlu0 %958 }
 0x941   : > { %1583 = vpow2.f32 %v950_v60  ;;  %v1568_v60 = vld [vmem:[%s2019_s7 + $0x8] sm:$0xff]  }
 0x943   : > { %v1582_v61 = vpop.eup %1581 }
 0x944   : > { %v836_v62 = vsel %vm599_vm6, %v1582_v61, 0.0 }
 0x945   : > { %837 = vadd.xlane.f32.xlu1 %v836_v62  ;;  %v1570_v62 = vld [vmem:[%s2019_s7 + $0x18] sm:$0xff]  }
 0x94b   : > { %v1584_v63 = vpop.eup %1583 }
 0x94c   : > { %v952_v0 = vsel %vm599_vm6, %v1584_v63, 0.0 }
 0x94d   : > { %953 = vadd.xlane.f32.xlu1 %v952_v0 }
 0x95e   : > { %842 = vrot.lane.b32.xlu1 %v1849_v51, %s1670_s25  ;;  %v964_v51 = vsel %vm618_vm5, %v959_v7, 0 }
 0x962   : > { %775 = vrot.lane.b32.xlu1 %v768_v40, %s1671_s26  ;;  %s1969_s26 = scalar_lea.hbm %s2020_s8, %s1375_s21 }
 0x9d2   : > { %v838_v1 = vpop.xlane.xlu1 %837 }
 0x9d3   : > { %1585 = vrcp.f32 %v838_v1 }
 0x9da   : > { %v954_v2 = vpop.xlane.xlu1 %953 }
 0x9db   : > { %1587 = vrcp.f32 %v954_v2 }
 0x9dd   : > { %v1586_v3 = vpop.eup %1585 }
 0x9de   : > { %v840_v4 = vmul.f32 %v1586_v3, %v1582_v61  ;;  %v843_v5 = vpop.permute.xlu1 %842  ;;  %v1569_v61 = vld [vmem:[%s2019_s7 + $0x10] sm:$0xff]  }
 0x9df   : > { %v848_v6 = vsel %vm618_vm5, %v843_v5, 0 }
 0x9e0   : > { %1448 = vmatpush3.bf16.msra.mxu0 %v848_v6  ;;  %v841_v8 = vpack.c.bf16 %v840_v4, %v840_v4 }
 0x9e1   : > { %1459 = vmatprep.subr.bf16.mxu0 %v1658_v28 }
 0x9e2   : > { %v776_v9 = vpop.permute.xlu1 %775 }
 0x9e3   : > { %779 = vst.msk [vmem:[#allocation2] sm:$0xf] %vm778_vm9, %v776_v9  ;;  %1450 = vmatmul.mubr.msk.bf16.vlgmr.msra.gmra.mrb[4].mxu0 %vm614_vm7, %v841_v8 }
 0x9e4   : > { %1460 = vmatpush3.bf16.msra.mxu0 %v964_v51  ;;  %1461 = vmatprep.mubr.msk.bf16.mxu0 %vm1659_vm2, %v1658_v28 }
 0x9e5   : > { %v1588_v10 = vpop.eup %1587  ;;  %1473 = vmatprep.subr.bf16.mxu0 %v1658_v28 }
 0x9e6   : > { %v956_v11 = vmul.f32 %v1588_v10, %v1584_v63  ;;  %v1109_v63 = vsub.s32 6, %v1833_v34 }
 0x9e8   : > { %v957_v12 = vpack.c.bf16 %v956_v11, %v956_v11  ;;  %v1110_v0 = vrot.slane %v1840_v37, %v1109_v63 }
 0x9eb   : > { %1462 = vmatmul.mubr.msk.bf16.vlgmr.msra.gmra.mrb[8].mxu0 %vm614_vm7, %v957_v12 }
 0x9ec   : > { %1477 = vmatprep.mubr.msk.bf16.mxu0 %vm1659_vm2, %v1658_v28  ;;  %1474 = vmatpush3.bf16.msra.mxu0 %v1565_v17 }
 0x9ed   : > { %1475 = vmatprep.subr.bf16.mxu0 %v1658_v28 }
 0x9f0   : > { %1476 = vmatpush3.bf16.msra.mxu0 %v1566_v45 }
 0xab6   : > { %v884_v15 = vpop.f32.mrb[4].mxu0 }
 0xab7   : > { %891 = vrot.lane.b32.xlu1 %v884_v15, %s1672_s18  ;;  %v1451_v16 = vpop.f32.mrb[5].mxu0  ;;  %v1178_v15 = vrot.slane %v1840_v37, %v1177_v14 }
 0xab8   : > { %v887_v18 = vpop.f32.mrb[6].mxu0 }
 0xab9   : > { %v1452_v19 = vpop.f32.mrb[7].mxu0 }
 0xabe   : > { %v1000_v20 = vpop.f32.mrb[8].mxu0 }
 0xabf   : > { %1007 = vrot.lane.b32.xlu1 %v1000_v20, %s1673_s19  ;;  %v1463_v21 = vpop.f32.mrb[9].mxu0  ;;  %s296_s19 = sand.u32 1, %s1647_s28  }
 0xac0   : > { %v1003_v22 = vpop.f32.mrb[10].mxu0  ;;  %s1335_s20 = sshll.u32 %s296_s19, 2  ;;  %s1259_s9 = scalar_lea.sflag [#allocation4], %s296_s19 }
 0xac1   : > { %v1464_v23 = vpop.f32.mrb[11].mxu0  ;;  %s298_s22 = scalar_lea.vmem [#allocation3], %s1335_s20 }
 0xac2   : > { %s1272_s23 = sshll.u32 %s298_s22, 4  ;;  %s1971_s23 = int_to_ptr.vmem [resolvable:$true] %s1272_s23 }
 0xac3   : > { %s1593_s10 = scalar_lea.vmem %s1971_s23, 64  ;;  %p1600_p0 = scmp.lt.s32.totalorder %s1971_s23, %s1598_s13 }
 0xac4   : > { %p1594_p11 = scmp.ne.s32.totalorder %s1971_s23, %s1593_s10  ;;  %p1601_p1 = scmp.lt.s32.totalorder %s1599_s17, %s1593_s10 }
 0xac6   : > { %p1595_p12 = pnand %p1594_p11, %p1758_p5  ;;  %p1602_p2 = por %p1601_p1, %p1600_p0 }
 0xac8   : > { %p1596_p13 = pneg %p1595_p12 }
 0xaca   : > { %p1603_p3 = pnand %p1602_p2, %p1596_p13 }
 0xb29   : > { %v892_v24 = vpop.permute.xlu1 %891 }
 0xb2a   : > { %895 = vst.msk [vmem:[#allocation2] sm:$0xf] %vm894_vm10, %v892_v24 }
 0xb31   : > { %v1008_v25 = vpop.permute.xlu1 %1007 }
 0xb32   : > { %1011 = vst.msk [vmem:[#allocation2] sm:$0xf] %vm1010_vm11, %v1008_v25 }
 0xb39   : > { %v1017_v26 = vld [vmem:[#allocation2] sm:$0xf] }
 0xb3a   : > { %v1018_v27 = vpack.c.bf16 %v1017_v26, %v1017_v26 }
 0xb3c   : > { %1470 = vmatmul.mubr.msk.bf16.vlgmr.msra.gmra.mrb[28].mxu1 %vm504_vm3, %v1018_v27 }
 0xb3d   : > { %1489 = vmatprep.mubr.msk.bf16.mxu1 %vm1659_vm2, %v1658_v28  ;;  %1482 = vmatpush3.bf16.msra.mxu1 %v1567_v59 }
 0xb3e   : > { %1483 = vmatprep.subr.bf16.mxu1 %v1658_v28 }
 0xb41   : > { %1484 = vmatpush3.bf16.msra.mxu1 %v1568_v60 }
 0xb42   : > { %1485 = vmatprep.subr.bf16.mxu1 %v1658_v28 }
 0xb45   : > { %1486 = vmatpush3.bf16.msra.mxu1 %v1569_v61 }
 0xb46   : > { %1487 = vmatprep.subr.bf16.mxu1 %v1658_v28 }
 0xb49   : > { %1488 = vmatpush3.bf16.msra.mxu1 %v1570_v62 }
 0xc0f   : > { %v1072_v32 = vpop.f32.mrb[28].mxu1 }
 0xc10   : > { %v1925_v33 = vadd.f32 %v1072_v32, %v1016_v31  ;;  %v1471_v35 = vpop.f32.mrb[29].mxu1 }
 0xc11   : > { %v1075_v36 = vpop.f32.mrb[30].mxu1 }
 0xc12   : > { %v1472_v38 = vpop.f32.mrb[31].mxu1  ;;  %v1079_v39 = vsel %vm458_vm1, %v1925_v33, 0.0  ;;  %v1179_v16 = vadd.f32 %v1178_v15, %v1925_v33 }
 0xc13   : > { %1080 = vadd.xlane.f32.xlu1 %v1079_v39 }
 0xca0   : > { %v1081_v40 = vpop.xlane.xlu1 %1080 }
 0xca1   : > { %v1082_v41 = vmul.f32 0.03125, %v1081_v40 }
 0xca3   : > { %v1083_v42 = vsub.f32 %v1925_v33, %v1082_v41 }
 0xca5   : > { %v1084_v43 = vmul.f32 %v1083_v42, %v1083_v42 }
 0xca7   : > { %v1085_v44 = vsel %vm458_vm1, %v1084_v43, 0.0 }
 0xca8   : > { %1086 = vadd.xlane.f32.xlu0 %v1085_v44 }
 0xd35   : > { %v1087_v46 = vpop.xlane.xlu0 %1086 }
 0xd36   : > { %v1088_v47 = vmul.f32 0.03125, %v1087_v46 }
 0xd38   : > { %v1089_v48 = vadd.f32 1e-06, %v1088_v47 }
 0xd3a   : > { %1589 = vrsqrt.f32 %v1089_v48 }
 0xd44   : > { %v1590_v53 = vpop.eup %1589 }
 0xd45   : > { %v1091_v54 = vmul.f32 %v1590_v53, %v1083_v42 }
 0xd47   : > { %v1096_v56 = vmul.f32 %v1095_v52, %v1091_v54 }
 0xd49   : > { %v1101_v57 = vadd.f32 %v1100_v55, %v1096_v56 }
 0xd4b   : > { %v1102_v58 = vpack.c.bf16 %v1101_v57, %v1101_v57 }
 0xd4d   : > { %1478 = vmatmul.mubr.msk.bf16.vlgmr.msra.gmra.mrb[12].mxu0 %vm504_vm3, %v1102_v58 }
 0xe20   : > { %v1160_v1 = vpop.f32.mrb[12].mxu0 }
 0xe21   : > { %v1161_v2 = vadd.f32 %v1160_v1, %v1110_v0  ;;  %v1479_v3 = vpop.f32.mrb[13].mxu0 }
 0xe22   : > { %v1163_v4 = vpop.f32.mrb[14].mxu0 }
 0xe23   : > { %v1167_v5 = vmul.f32 0.044715, %v1161_v2  ;;  %v1480_v6 = vpop.f32.mrb[15].mxu0  ;;  %v1166_v28 = vmul.f32 0.5, %v1161_v2 }
 0xe25   : > { %v1168_v7 = vmul.f32 %v1167_v5, %v1161_v2 }
 0xe27   : > { %v1169_v8 = vmul.f32 %v1168_v7, %v1161_v2 }
 0xe29   : > { %v1170_v9 = vadd.f32 %v1169_v8, %v1161_v2 }
 0xe2b   : > { %v1171_v51 = vmul.f32 0.7978846, %v1170_v9 }
 0xe2d   : > { %1591 = vtanh.f32 %v1171_v51 }
 0xe37   : > { %v1592_v10 = vpop.eup %1591 }
 0xe38   : > { %v1173_v11 = vadd.f32 1.0, %v1592_v10 }
 0xe3a   : > { %v1174_v12 = vmul.f32 %v1173_v11, %v1166_v28 }
 0xe3c   : > { %v1180_v13 = vpack.c.bf16 %v1174_v12, %v1174_v12 }
 0xe3e   : > { %1490 = vmatmul.mubr.msk.bf16.vlgmr.msra.gmra.mrb[32].mxu1 %vm413_vm0, %v1180_v13 }
 0xf11   : > { %v1250_v18 = vpop.f32.mrb[32].mxu1 }
 0xf12   : > { %v1256_v19 = vadd.f32 %v1250_v18, %v1179_v16  ;;  %v1491_v20 = vpop.f32.mrb[33].mxu1 }
 0xf13   : > { %v1253_v34 = vpop.f32.mrb[34].mxu1 }
 0xf14   : > { %v1492_v37 = vpop.f32.mrb[35].mxu1  ;;  %1257 = vst.msk [vmem:[%s298_s22] sm:$0xf] %vm458_vm1, %v1256_v19 }
 0xf15   : > { %1606 = shalt.err (!%p1603_p3)
}
 0xf16   : > { %s1607_s18 = scalar_lea.hbm %s1969_s26, 64  ;;  %s1611_s21 = scalar_lea.hbm %s2020_s8, 128 }
 0xf17   : > { %p1608_p4 = scmp.ne.s32.totalorder %s1969_s26, %s1607_s18  ;;  %p1612_p9 = scmp.lt.u32.totalorder %s1969_s26, %s2020_s8 }
 0xf18   : > { %p1613_p10 = scmp.lt.u32.totalorder %s1611_s21, %s1607_s18  ;;  %p1615_p12 = scmp.lt.u32.totalorder %s1607_s18, %s1969_s26 }
 0xf19   : > { %p1609_p7 = pnand %p1608_p4, %p1758_p5 }
 0xf1a   : > { %p1614_p11 = por %p1613_p10, %p1612_p9 }
 0xf1b   : > { %p1610_p8 = pneg %p1609_p7 }
 0xf1c   : > { %p1616_p13 = por %p1615_p12, %p1614_p11 }
 0xf1e   : > { %p1617_p0 = pnand %p1616_p13, %p1610_p8 }
 0xf20   : > { %1620 = shalt.err (!%p1617_p0)
}
 0xf21   : > { %1493 = dma.vmem_to_hbm [thread:$0]  (%p1758_p5), %s1971_s23, 64, %s1969_s26, %s1259_s9  }
 0xf22 PF: > { %p1499_p1 = scmp.ge.s32.totalorder %s1655_s30, 2  ;;  %s1284_s25 = sand.u32 1, %s1643_s27  }
 0xf23   : > { %s1285_s10 = scalar_lea.sflag [#allocation4], %s1284_s25 }
 0xf24   : > { %p1496_p2 = pnand %p1499_p1, %p1762_p6 }
 0xf26   : > { %1638 = dma.done.wait (!%p1496_p2), %s1285_s10, 64  }
 0xf27   : > { %1640 = vsyncadd (!%p1496_p2), %s1285_s10, 4294967232  ;;  %p18_p3 = scmp.ge.s32.totalorder %s1745_s11, 4   ;;  %s2023_s27 = smov %s1647_s28 }
 0xf28   : > { %s2024_s28 = smov %s1651_s29  ;;  %s2025_s29 = smov %s1756_s14 }
 0xf29   : > { %s2026_s30 = smov %s1745_s11  ;;  %20 = sbr.rel (!%p18_p3) target bundleno = 3 (0x3), region = 87 }
 0xf30   :  { %1290 = vsyncpa [#allocation4], 1 }
 0xf31   :  { %1292 = vsyncpa [#allocation4 + $0x1], 1 }

</bundles_post_ra>
